<compile_context>
chip_gen: v5e
topology: v5e:2x2
jax: 0.10.0
libtpu: 0.0.40
codegen_flags: <defaults>
</compile_context>

<pallas_src>
import jax
import jax.numpy as jnp
from jax.experimental import pallas as pl
from jax.experimental.pallas import tpu as pltpu


# --------------------------------------------------------------------------
# Tiling constants
# --------------------------------------------------------------------------
_TM = 2048                 # output-row tile (multiple of 256)
_TK = 512                  # contraction tile (multiple of 256)
_ROW_ALIGN = 256           # node-dim padding granularity (bf16 tile friendly)
_VMEM_LIMIT = 48 * 1024 * 1024         # fits v7x's 64 MiB/TC with headroom
_X_RESIDENT_BYTES = 24 * 1024 * 1024   # budget (2 buffers) for a resident X


def _round_up(n, m):
    return ((n + m - 1) // m) * m


def _choose_row_tile(m):
    """Multiple of 256 that divides m, <= _TM, and gives >=2 tiles when m > 256
    (keeps both v7x TensorCores / megacore busy)."""
    if m <= _ROW_ALIGN:
        return m
    tm = min(_TM, m // 2)
    tm = max(_ROW_ALIGN, (tm // _ROW_ALIGN) * _ROW_ALIGN)
    while m % tm:
        tm -= _ROW_ALIGN
    return tm


def _choose_k_tile(k):
    """Multiple of 256 that divides k, <= _TK."""
    if k <= _TK:
        return k
    tk = (_TK // _ROW_ALIGN) * _ROW_ALIGN
    while k % tk:
        tk -= _ROW_ALIGN
    return tk


# --------------------------------------------------------------------------
# Tiled matmul kernel:  O = A @ X  with f32 accumulation.
# Grid = (M tiles ["parallel"], K tiles ["arbitrary", last]).  Output tile is
# resident across K.  X is either fully VMEM-resident (sliced in-kernel) or
# streamed per K tile.  When the output dtype is f32 we accumulate directly
# into o_ref (no scratch); otherwise a f32 scratch + finalize cast is used.
# --------------------------------------------------------------------------
def _make_matmul_kernel(tk, x_resident, use_scratch):
    def _step(a_ref, x_ref, o_ref, acc_ref):
        k = pl.program_id(1)

        @pl.when(k == 0)
        def _():
            acc_ref[...] = jnp.zeros_like(acc_ref)

        a = a_ref[...]
        if x_resident:
            start = pl.multiple_of(k * tk, _ROW_ALIGN)
            x = x_ref[pl.ds(start, tk), :]
        else:
            x = x_ref[...]
        if x.dtype != a.dtype:
            # Fold the wrapper-side astype into the kernel (VPU cast is free
            # under MXU / HBM slack); avoids an extra HBM read+write pass.
            x = x.astype(a.dtype)
        acc_ref[...] += jnp.dot(a, x, preferred_element_type=jnp.float32)

        if use_scratch:
            @pl.when(k == pl.num_programs(1) - 1)
            def _():
                o_ref[...] = acc_ref[...].astype(o_ref.dtype)

    if use_scratch:
        def kernel(a_ref, x_ref, o_ref, acc_ref):
            _step(a_ref, x_ref, o_ref, acc_ref)
    else:
        def kernel(a_ref, x_ref, o_ref):
            _step(a_ref, x_ref, o_ref, o_ref)
    return kernel


def tiled_matmul(a, x, out_dtype):
    """O[M, D] = A[M, K] @ X[K, D].

    D must be a multiple of 128 (lane-dense); M and K must be multiples of 256
    (the layer pads node dims accordingly).
    """
    M, K = a.shape
    K2, D = x.shape
    assert K == K2, (a.shape, x.shape)
    assert D % 128 == 0, "pad hidden dim to a multiple of 128"
    assert M % _ROW_ALIGN == 0 and K % _ROW_ALIGN == 0, (M, K)

    tm = _choose_row_tile(M)
    tk = _choose_k_tile(K)
    grid = (M // tm, K // tk)

    # Resident X: loaded into VMEM once, never re-streamed per M tile.
    # Conservatively budget 2 buffers; threshold keeps the whole plan under
    # v7x's 64 MiB/TC (v5e/v6e have 128 MiB and could go larger).
    x_resident = 2 * x.size * x.dtype.itemsize <= _X_RESIDENT_BYTES
    if x_resident:
        x_spec = pl.BlockSpec((K, D), lambda i, k: (0, 0))
        x_reads = 1
    else:
        x_spec = pl.BlockSpec((tk, D), lambda i, k: (k, 0))
        x_reads = M // tm

    use_scratch = jnp.dtype(out_dtype) != jnp.dtype(jnp.float32)
    scratch_shapes = [pltpu.VMEM((tm, D), jnp.float32)] if use_scratch else []

    bytes_accessed = (a.size * a.dtype.itemsize
                      + x_reads * x.size * x.dtype.itemsize
                      + M * D * jnp.dtype(out_dtype).itemsize)

    return pl.pallas_call(
        _make_matmul_kernel(tk, x_resident, use_scratch),
        out_shape=jax.ShapeDtypeStruct((M, D), out_dtype),
        grid_spec=pltpu.PrefetchScalarGridSpec(
            num_scalar_prefetch=0,
            grid=grid,
            in_specs=[
                pl.BlockSpec((tm, tk), lambda i, k: (i, k)),
                x_spec,
            ],
            out_specs=pl.BlockSpec((tm, D), lambda i, k: (i, 0)),
            scratch_shapes=scratch_shapes,
        ),
        compiler_params=pltpu.CompilerParams(
            dimension_semantics=("parallel", "arbitrary"),
            vmem_limit_bytes=_VMEM_LIMIT,
        ),
        cost_estimate=pl.CostEstimate(
            flops=2 * M * K * D,
            transcendentals=0,
            bytes_accessed=int(bytes_accessed),
        ),
    )(a, x)


# --------------------------------------------------------------------------
# Helpers
# --------------------------------------------------------------------------
def _pad2d(x, rows, cols):
    return jnp.pad(x, ((0, rows - x.shape[0]), (0, cols - x.shape[1])))


def _inv_sqrt_deg(d):
    safe = jnp.where(d > 0, d, 1.0)
    return jnp.where(d > 0, jax.lax.rsqrt(safe), 0.0)


# --------------------------------------------------------------------------
# LightGCNLayer
# --------------------------------------------------------------------------
class LightGCNLayerPallas:
    """Pallas port of LightGCNLayer (forward / eval mode).

    adjacencies: list of dense (n_users, n_items) {0,1} float matrices, one per
    edge type (stands in for the dgl heterograph).
    """

    def __init__(self, adjacencies, drop_out=0.1, compute_dtype=jnp.bfloat16):
        del drop_out  # eval mode: dropout is identity (see TODO at top).
        adj = jnp.stack(adjacencies).astype(jnp.float32)       # (R, U, I) user -> item
        R, U, I = adj.shape
        self.U, self.I = U, I
        self.compute_dtype = compute_dtype

        # Per-edge-type symmetric degree norms (f32, once at init).
        u_deg = adj.sum(axis=2)                                 # (R, U)
        i_deg = adj.sum(axis=1)                                 # (R, I)
        cj_user = _inv_sqrt_deg(u_deg)                          # src norm (users)
        ci_item = _inv_sqrt_deg(i_deg)                          # dst norm (items)

        # HeteroGraphConv(sum of LightGraphConv over edge types), folded:
        #   item_conv = sum_r diag(ci_item_r) @ A_r^T @ diag(cj_user_r) @ ufeats
        #             = A_item @ ufeats
        # (The user-side conv output of the original module is dead: the forward
        #  overwrites `ufeats` with normed_adj_u @ item_conv before using it.)
        a_item = jnp.einsum('rui,ri,ru->iu', adj, ci_item, cj_user)   # (I, U)

        # degree_normalization(graph): symmetric-normalized bipartite adjacency.
        a_total = adj.sum(axis=0)                                # (U, I)
        du = _inv_sqrt_deg(a_total.sum(axis=1, keepdims=True))   # (U, 1)
        di = _inv_sqrt_deg(a_total.sum(axis=0, keepdims=True))   # (1, I)
        n_u = du * a_total * di                                  # (U, I)
        n_v = n_u.T                                              # (I, U)

        # Pad node dims to multiples of 256 (bf16 (16,128)-tile aligned) so all
        # three matmuls get unmasked, lane-dense vreg tiles even for tiny
        # graphs; store static operands in the MXU compute dtype.
        # TODO(synk): int8 (v5e/v6e) / fp8 (v7x) adjacency with finalize scale.
        # TODO(synk): block-CSR of nonzero (TM,TK) tiles + scalar-prefetch
        #             index tables to skip empty tiles on realistic graphs.
        self.Up = _round_up(U, _ROW_ALIGN)
        self.Ip = _round_up(I, _ROW_ALIGN)
        self.A_item = _pad2d(a_item, self.Ip, self.Up).astype(compute_dtype)  # (Ip, Up)
        self.N_u = _pad2d(n_u, self.Up, self.Ip).astype(compute_dtype)        # (Up, Ip)
        self.N_v = _pad2d(n_v, self.Ip, self.Up).astype(compute_dtype)        # (Ip, Up)

    def __call__(self, ufeats, ifeats):
        # `ifeats` never influences the outputs of the original forward (its
        # conv result is overwritten before use); kept only for API parity.
        del ifeats
        U, D = ufeats.shape
        assert U == self.U
        Dp = _round_up(max(D, 128), 128)                    # lane-dense hidden
        u_pad = _pad2d(ufeats, self.Up, Dp).astype(self.compute_dtype)

        # 1. HeteroGraphConv(sum) with LightGraphConv -> single folded matmul.
        item_out = tiled_matmul(self.A_item, u_pad, out_dtype=self.compute_dtype)  # (Ip, Dp)
        # 2. feature dropout: identity (eval mode).
        # 3. normalized-adjacency propagation (torch.sparse.mm equivalents).
        #    u_new stays f32; the third matmul casts it to bf16 in-kernel.
        u_new = tiled_matmul(self.N_u, item_out, out_dtype=jnp.float32)            # (Up, Dp)
        i_new = tiled_matmul(self.N_v, u_new, out_dtype=jnp.float32)               # (Ip, Dp)
        return u_new[:self.U, :D], i_new[:self.I, :D]


# --------------------------------------------------------------------------
# References for correctness checks.
# --------------------------------------------------------------------------
def matched_reference(layer, ufeats):
    """Pure-JAX reference using the SAME folded bf16 operands / cast points."""
    U, D = ufeats.shape
    Dp = _round_up(max(D, 128), 128)
    u_pad = _pad2d(ufeats, layer.Up, Dp).astype(layer.compute_dtype)
    item_out = jnp.dot(layer.A_item, u_pad,
                       preferred_element_type=jnp.float32).astype(layer.compute_dtype)
    u_new = jnp.dot(layer.N_u, item_out, preferred_element_type=jnp.float32)
    i_new = jnp.dot(layer.N_v, u_new.astype(layer.compute_dtype),
                    preferred_element_type=jnp.float32)
    return u_new[:layer.U, :D], i_new[:layer.I, :D]


def f32_reference(adjacencies, ufeats):
    """Un-folded full-f32 reference mirroring the original module's forward."""
    adj = jnp.stack(adjacencies).astype(jnp.float32)          # (R, U, I)
    cj_user = _inv_sqrt_deg(adj.sum(axis=2, keepdims=True))   # (R, U, 1)
    ci_item = _inv_sqrt_deg(adj.sum(axis=1)[..., None])       # (R, I, 1)
    item_out = jnp.zeros((adj.shape[2], ufeats.shape[1]), jnp.float32)
    for r in range(adj.shape[0]):
        item_out = item_out + ci_item[r] * (adj[r].T @ (cj_user[r] * ufeats))
    a_total = adj.sum(axis=0)
    du = _inv_sqrt_deg(a_total.sum(axis=1, keepdims=True))
    di = _inv_sqrt_deg(a_total.sum(axis=0, keepdims=True))
    n_u = du * a_total * di
    u_new = n_u @ item_out
    i_new = n_u.T @ u_new
    return u_new, i_new


if __name__ == "__main__":
    key = jax.random.PRNGKey(0)
    n_users, n_items, hidden, n_edge_types = 16, 24, 32, 2

    keys = jax.random.split(key, 2 + n_edge_types)
    ufeats = jax.random.normal(keys[0], (n_users, hidden), dtype=jnp.float32)
    ifeats = jax.random.normal(keys[1], (n_items, hidden), dtype=jnp.float32)
    adjacencies = [
        (jax.random.uniform(keys[2 + r], (n_users, n_items)) < 0.3).astype(jnp.float32)
        for r in range(n_edge_types)
    ]

    layer = LightGCNLayerPallas(adjacencies, drop_out=0.1)
    u_out, i_out = layer(ufeats, ifeats)
    u_out = jax.block_until_ready(u_out)
    i_out = jax.block_until_ready(i_out)
    assert u_out.shape == (n_users, hidden) and i_out.shape == (n_items, hidden)

    # 1) Kernel correctness vs. pure JAX using identical bf16 operands.
    u_ref, i_ref = matched_reference(layer, ufeats)
    assert jnp.allclose(u_out, u_ref, atol=1e-3, rtol=1e-3), \
        float(jnp.max(jnp.abs(u_out - u_ref)))
    assert jnp.allclose(i_out, i_ref, atol=1e-3, rtol=1e-3), \
        float(jnp.max(jnp.abs(i_out - i_ref)))

    # 2) Semantics check vs. un-folded full-f32 math (loose tol: bf16 MXU inputs).
    u_f32, i_f32 = f32_reference(adjacencies, ufeats)
    assert jnp.allclose(u_out, u_f32, atol=1e-1, rtol=1e-1)
    assert jnp.allclose(i_out, i_f32, atol=1e-1, rtol=1e-1)

    print("KERNEL_OK")
</pallas_src>

<mosaic_0001>
module attributes {stable_mosaic.version = 11 : i64} {
  func.func @kernel(%arg0: i32, %arg1: i32, %arg2: memref<256x256xbf16, #tpu.memory_space<vmem>>, %arg3: memref<256x128xbf16, #tpu.memory_space<vmem>>, %arg4: memref<256x128xbf16, #tpu.memory_space<vmem>>, %arg5: memref<256x128xf32, #tpu.memory_space<vmem>>) attributes {dimension_semantics = [#tpu.dimension_semantics<parallel>, #tpu.dimension_semantics<arbitrary>], iteration_bounds = array<i64: 1, 1>, scalar_prefetch = 0 : i64, scratch_operands = 1 : i64, tpu.core_type = #tpu.core_type<tc>, window_params = [{transform_indices = @transform_0, window_bounds = array<i64: 256, 256>}, {pipeline_mode = #tpu.pipeline_mode<synchronous>, transform_indices = @transform_1, window_bounds = array<i64: 256, 128>}, {transform_indices = @transform_2, window_bounds = array<i64: 256, 128>}]} {
    %c0_i32 = arith.constant 0 : i32
    %0 = arith.cmpi eq, %arg1, %c0_i32 : i32
    %1 = arith.extui %0 : i1 to i32
    %c0_i32_0 = arith.constant 0 : i32
    %2 = arith.cmpi ne, %1, %c0_i32_0 : i32
    scf.if %2 {
      %cst_9 = arith.constant 0.000000e+00 : f32
      %15 = vector.broadcast %cst_9 : f32 to vector<256x128xf32>
      %c0_10 = arith.constant 0 : index
      %c0_11 = arith.constant 0 : index
      %16 = vector.load %arg5[%c0_10, %c0_11] : memref<256x128xf32, #tpu.memory_space<vmem>>, vector<256x128xf32>
      tpu.vector_store %arg5[%c0_10, %c0_11], %15 {strides = array<i32>} : memref<256x128xf32, #tpu.memory_space<vmem>>, vector<256x128xf32>,
    } else {
    }
    %c0 = arith.constant 0 : index
    %c0_1 = arith.constant 0 : index
    %3 = vector.load %arg2[%c0, %c0_1] : memref<256x256xbf16, #tpu.memory_space<vmem>>, vector<256x256xbf16>
    %c256_i32 = arith.constant 256 : i32
    %4 = arith.muli %arg1, %c256_i32 : i32
    %5 = tpu.assume_multiple %4, 256 : i32
    %6 = arith.index_cast %5 : i32 to index
    %c0_2 = arith.constant 0 : index
    %7 = vector.load %arg3[%6, %c0_2] : memref<256x128xbf16, #tpu.memory_space<vmem>>, vector<256x128xbf16>
    %c0_3 = arith.constant 0 : index
    %c0_4 = arith.constant 0 : index
    %8 = vector.load %arg5[%c0_3, %c0_4] : memref<256x128xf32, #tpu.memory_space<vmem>>, vector<256x128xf32>
    %cst = arith.constant dense<0.000000e+00> : vector<256x128xf32>
    %9 = tpu.matmul %3, %7, %cst {dimension_numbers = #tpu.dot_dimension_numbers<[1], [0], [0], [1], [0, 0, 1, 1], [], []>} : vector<256x256xbf16>, vector<256x128xbf16>, vector<256x128xf32> -> vector<256x128xf32>
    %10 = arith.addf %8, %9 : vector<256x128xf32>
    %c0_5 = arith.constant 0 : index
    %c0_6 = arith.constant 0 : index
    %11 = vector.load %arg5[%c0_5, %c0_6] : memref<256x128xf32, #tpu.memory_space<vmem>>, vector<256x128xf32>
    tpu.vector_store %arg5[%c0_5, %c0_6], %10 {strides = array<i32>} : memref<256x128xf32, #tpu.memory_space<vmem>>, vector<256x128xf32>,
    %c0_i32_7 = arith.constant 0 : i32
    %12 = arith.cmpi eq, %arg1, %c0_i32_7 : i32
    %13 = arith.extui %12 : i1 to i32
    %c0_i32_8 = arith.constant 0 : i32
    %14 = arith.cmpi ne, %13, %c0_i32_8 : i32
    scf.if %14 {
      %c0_9 = arith.constant 0 : index
      %c0_10 = arith.constant 0 : index
      %15 = vector.load %arg5[%c0_9, %c0_10] : memref<256x128xf32, #tpu.memory_space<vmem>>, vector<256x128xf32>
      %16 = arith.truncf %15 : vector<256x128xf32> to vector<256x128xbf16>
      %c0_11 = arith.constant 0 : index
      %c0_12 = arith.constant 0 : index
      %17 = vector.load %arg4[%c0_11, %c0_12] : memref<256x128xbf16, #tpu.memory_space<vmem>>, vector<256x128xbf16>
      tpu.vector_store %arg4[%c0_11, %c0_12], %16 {strides = array<i32>} : memref<256x128xbf16, #tpu.memory_space<vmem>>, vector<256x128xbf16>,
    } else {
    }
    return
  }
  func.func @transform_0(%arg0: i32, %arg1: i32) -> (i32, i32) {
    %c0_i32 = arith.constant 0 : i32
    return %arg0, %arg1 : i32, i32
  }
  func.func @transform_1(%arg0: i32, %arg1: i32) -> (i32, i32) {
    %c0_i32 = arith.constant 0 : i32
    %c0_i32_0 = arith.constant 0 : i32
    %c0_i32_1 = arith.constant 0 : i32
    return %c0_i32, %c0_i32_0 : i32, i32
  }
  func.func @transform_2(%arg0: i32, %arg1: i32) -> (i32, i32) {
    %c0_i32 = arith.constant 0 : i32
    %c0_i32_0 = arith.constant 0 : i32
    return %arg0, %c0_i32 : i32, i32
  }
}

</mosaic_0001>

<bundles_post_ra>
// kernel: tpu_custom_call.1
= control target key start
LH: loop header
LB: loop body
LE: loop exit
PB: predicated region body
PF: predicated region fallthrough
CT: control target
= control target key end

     0   :  { %7 = vsyncpa [#allocation4], 0  ;;  %s1273_s0 = inlined_call_operand.hbm [shape: bf16[256,256], index: 0, kind: input, shape index: {}]   ;;  %s1274_s1 = inlined_call_operand.hbm [shape: bf16[256,128], index: 1, kind: input, shape index: {}]   ;;  %s1275_s2 = inlined_call_operand.hbm [shape: bf16[256,128], index: 2, kind: output, shape index: {}]  }
   0x1   :  { %8 = vsyncpa [#allocation7], 0 }
   0x2   :  { %9 = vsyncpa [#allocation5], 0  ;;  %s14_s11 = sshll.u32 %s1273_s0, 4  ;;  %s1236_s12 = smov [#allocation3]   ;;  %s15_s11 = int_to_ptr.hbm [resolvable:$true] %s14_s11 }
   0x3   :  { %s16_s13 = sshll.u32 %s1236_s12, 4  ;;  %s27_s16 = sshll.u32 %s1274_s1, 4  ;;  %s17_s13 = int_to_ptr.vmem [resolvable:$true] %s16_s13  ;;  %s28_s16 = int_to_ptr.hbm [resolvable:$true] %s27_s16 }
   0x4   :  { %s1237_s17 = smov 128   ;;  %s1238_s18 = smov 8  }
   0x5   :  { %22 = dma.hbm_to_vmem [thread:$0]  %s15_s11, 4096, %s17_s13, [#allocation4], %s1237_s17, %s1237_s17, %s1238_s18  }
   0x6   :  { %s1239_s19 = smov [#allocation6]   ;;  %s1240_s21 = smov 64  }
   0x7   :  { %s29_s20 = sshll.u32 %s1239_s19, 4  ;;  %s1241_s22 = smov 4   ;;  %s30_s20 = int_to_ptr.vmem [resolvable:$true] %s29_s20 }
   0x8   :  { %35 = dma.hbm_to_vmem [thread:$0]  %s28_s16, 2048, %s30_s20, [#allocation7], %s1240_s21, %s1240_s21, %s1241_s22  }
   0x9   :  { %1230 = dma.done.wait [#allocation4], 4096  }
   0xa   :  { %1231 = vsyncadd [#allocation4], 4294963200 }
   0xb   :  { %1232 = dma.done.wait [#allocation7], 2048  }
   0xc   :  { %1233 = vsyncadd [#allocation7], 4294965248  ;;  %v1031_v0 = vld [vmem:[#allocation6 + $0x38] sm:$0xff]  ;;  %v1030_v2 = vld [vmem:[#allocation6 + $0x30] sm:$0xff]  ;;  %s1242_s0 = smov [#allocation8]   ;;  %s784_s25 = sshll.u32 %s1275_s2, 4  ;;  %s785_s25 = int_to_ptr.hbm [resolvable:$true] %s784_s25 }
   0xd   :  { %v1039_v1 = vld [vmem:[#allocation6 + $0x78] sm:$0xff]  ;;  %437 = vmatpush.bf16.msra.mxu0 %v1031_v0  ;;  %1135 = vmatpush.bf16.msra.mxu2 %v1031_v0  ;;  %v1038_v3 = vld [vmem:[#allocation6 + $0x70] sm:$0xff]  ;;  %v1029_v4 = vld [vmem:[#allocation6 + $0x28] sm:$0xff]  ;;  %s782_s1 = sshll.u32 %s1242_s0, 4  ;;  %s783_s1 = int_to_ptr.vmem [resolvable:$true] %s782_s1 }
   0xe   :  { %526 = vmatpush.bf16.msra.mxu1 %v1039_v1  ;;  %1143 = vmatpush.bf16.msra.mxu3 %v1039_v1  ;;  %v1037_v5 = vld [vmem:[#allocation6 + $0x68] sm:$0xff]  ;;  %v1028_v6 = vld [vmem:[#allocation6 + $0x20] sm:$0xff]  ;;  %v1027_v8 = vld [vmem:[#allocation6 + $0x18] sm:$0xff] }
   0xf   :  { %v1036_v7 = vld [vmem:[#allocation6 + $0x60] sm:$0xff]  ;;  %v1035_v9 = vld [vmem:[#allocation6 + $0x58] sm:$0xff]  ;;  %v1026_v10 = vld [vmem:[#allocation6 + $0x10] sm:$0xff] }
  0x10   :  { %v1034_v11 = vld [vmem:[#allocation6 + $0x50] sm:$0xff]  ;;  %v1025_v12 = vld [vmem:[#allocation6 + $0x8] sm:$0xff]  ;;  %v1024_v14 = vld [vmem:[#allocation6] sm:$0xff] }
  0x11   :  { %438 = vmatpush.bf16.msra.mxu0 %v1030_v2  ;;  %1136 = vmatpush.bf16.msra.mxu2 %v1030_v2  ;;  %v1033_v13 = vld [vmem:[#allocation6 + $0x48] sm:$0xff]  ;;  %v1032_v15 = vld [vmem:[#allocation6 + $0x40] sm:$0xff]  ;;  %v810_v28 = vld [vmem:[#allocation3 + $0x10] sm:$0xf] }
  0x12   :  { %527 = vmatpush.bf16.msra.mxu1 %v1038_v3  ;;  %1144 = vmatpush.bf16.msra.mxu3 %v1038_v3  ;;  %v802_v16 = vld [vmem:[#allocation3] sm:$0xf]  ;;  %v993_v17 = vld [vmem:[#allocation3 + $0x4] sm:$0xf0]  ;;  %v992_v20 = vld [vmem:[#allocation3 + $0x4] sm:$0xf] }
  0x13   :  { %v866_v18 = vld [vmem:[#allocation3 + $0x80] sm:$0xf]  ;;  %v1009_v19 = vld [vmem:[#allocation3 + $0x84] sm:$0xf0]  ;;  %v804_v21 = vld [vmem:[#allocation3 + $0x8] sm:$0xf0]  ;;  %v803_v24 = vor.u32 %v993_v17, %v802_v16 }
  0x14   :  { %v1008_v22 = vld [vmem:[#allocation3 + $0x84] sm:$0xf]  ;;  %v868_v23 = vld [vmem:[#allocation3 + $0x88] sm:$0xf0]  ;;  %v867_v25 = vor.u32 %v1009_v19, %v866_v18  ;;  %v807_v26 = vor.u32 %v992_v20, %v804_v21  ;;  %v995_v29 = vld [vmem:[#allocation3 + $0x14] sm:$0xf0] }
  0x15   :  { %439 = vmatpush.bf16.msra.mxu0 %v1029_v4  ;;  %1137 = vmatpush.bf16.msra.mxu2 %v1029_v4  ;;  %v871_v27 = vor.u32 %v1008_v22, %v868_v23  ;;  %v874_v30 = vld [vmem:[#allocation3 + $0x90] sm:$0xf]  ;;  %v1011_v31 = vld [vmem:[#allocation3 + $0x94] sm:$0xf0]  ;;  %v994_v32 = vld [vmem:[#allocation3 + $0x14] sm:$0xf]  ;;  %v811_v36 = vor.u32 %v995_v29, %v810_v28 }
  0x16   :  { %528 = vmatpush.bf16.msra.mxu1 %v1037_v5  ;;  %1145 = vmatpush.bf16.msra.mxu3 %v1037_v5  ;;  %v812_v33 = vld [vmem:[#allocation3 + $0x18] sm:$0xf0]  ;;  %v1010_v34 = vld [vmem:[#allocation3 + $0x94] sm:$0xf]  ;;  %v875_v37 = vor.u32 %v1011_v31, %v874_v30  ;;  %v818_v40 = vld [vmem:[#allocation3 + $0x20] sm:$0xf] }
  0x17   :  { %v876_v35 = vld [vmem:[#allocation3 + $0x98] sm:$0xf0]  ;;  %v815_v38 = vor.u32 %v994_v32, %v812_v33  ;;  %v997_v41 = vld [vmem:[#allocation3 + $0x24] sm:$0xf0]  ;;  %v882_v42 = vld [vmem:[#allocation3 + $0xa0] sm:$0xf] }
  0x18   :  { %v879_v39 = vor.u32 %v1010_v34, %v876_v35  ;;  %v1013_v43 = vld [vmem:[#allocation3 + $0xa4] sm:$0xf0]  ;;  %v996_v44 = vld [vmem:[#allocation3 + $0x24] sm:$0xf]  ;;  %v820_v45 = vld [vmem:[#allocation3 + $0x28] sm:$0xf0]  ;;  %v819_v48 = vor.u32 %v997_v41, %v818_v40 }
  0x19   :  { %440 = vmatpush.bf16.msra.mxu0 %v1028_v6  ;;  %1138 = vmatpush.bf16.msra.mxu2 %v1028_v6  ;;  %v1012_v46 = vld [vmem:[#allocation3 + $0xa4] sm:$0xf]  ;;  %v884_v47 = vld [vmem:[#allocation3 + $0xa8] sm:$0xf0]  ;;  %v883_v49 = vor.u32 %v1013_v43, %v882_v42  ;;  %v823_v50 = vor.u32 %v996_v44, %v820_v45  ;;  %v826_v52 = vld [vmem:[#allocation3 + $0x30] sm:$0xf] }
  0x1a   :  { %529 = vmatpush.bf16.msra.mxu1 %v1036_v7  ;;  %1146 = vmatpush.bf16.msra.mxu3 %v1036_v7  ;;  %v887_v51 = vor.u32 %v1012_v46, %v884_v47  ;;  %v999_v53 = vld [vmem:[#allocation3 + $0x34] sm:$0xf0]  ;;  %v890_v54 = vld [vmem:[#allocation3 + $0xb0] sm:$0xf]  ;;  %v998_v56 = vld [vmem:[#allocation3 + $0x34] sm:$0xf] }
  0x1b   :  { %v1015_v55 = vld [vmem:[#allocation3 + $0xb4] sm:$0xf0]  ;;  %v828_v57 = vld [vmem:[#allocation3 + $0x38] sm:$0xf0]  ;;  %v1014_v58 = vld [vmem:[#allocation3 + $0xb4] sm:$0xf]  ;;  %v827_v60 = vor.u32 %v999_v53, %v826_v52 }
  0x1c   :  { %v892_v59 = vld [vmem:[#allocation3 + $0xb8] sm:$0xf0]  ;;  %v891_v61 = vor.u32 %v1015_v55, %v890_v54  ;;  %v831_v62 = vor.u32 %v998_v56, %v828_v57  ;;  %v834_v0 = vld [vmem:[#allocation3 + $0x40] sm:$0xf]  ;;  %v1001_v1 = vld [vmem:[#allocation3 + $0x44] sm:$0xf0] }
  0x1d   :  { %441 = vmatpush.bf16.msra.mxu0 %v1027_v8  ;;  %1139 = vmatpush.bf16.msra.mxu2 %v1027_v8  ;;  %v895_v63 = vor.u32 %v1014_v58, %v892_v59  ;;  %v898_v2 = vld [vmem:[#allocation3 + $0xc0] sm:$0xf]  ;;  %v1017_v3 = vld [vmem:[#allocation3 + $0xc4] sm:$0xf0]  ;;  %v1000_v4 = vld [vmem:[#allocation3 + $0x44] sm:$0xf]  ;;  %v835_v8 = vor.u32 %v1001_v1, %v834_v0 }
  0x1e   :  { %530 = vmatpush.bf16.msra.mxu1 %v1035_v9  ;;  %1147 = vmatpush.bf16.msra.mxu3 %v1035_v9  ;;  %v836_v5 = vld [vmem:[#allocation3 + $0x48] sm:$0xf0]  ;;  %v1016_v6 = vld [vmem:[#allocation3 + $0xc4] sm:$0xf]  ;;  %v899_v9 = vor.u32 %v1017_v3, %v898_v2  ;;  %v1002_v16 = vld [vmem:[#allocation3 + $0x54] sm:$0xf] }
  0x1f   :  { %v900_v7 = vld [vmem:[#allocation3 + $0xc8] sm:$0xf0]  ;;  %v844_v17 = vld [vmem:[#allocation3 + $0x58] sm:$0xf0]  ;;  %v1018_v18 = vld [vmem:[#allocation3 + $0xd4] sm:$0xf] }
  0x20   :  { %v908_v19 = vld [vmem:[#allocation3 + $0xd8] sm:$0xf0]  ;;  %v847_v22 = vor.u32 %v1002_v16, %v844_v17  ;;  %v1004_v28 = vld [vmem:[#allocation3 + $0x64] sm:$0xf]  ;;  %v852_v29 = vld [vmem:[#allocation3 + $0x68] sm:$0xf0] }
  0x21   :  { %442 = vmatpush.bf16.msra.mxu0 %v1026_v10  ;;  %1140 = vmatpush.bf16.msra.mxu2 %v1026_v10  ;;  %v839_v10 = vor.u32 %v1000_v4, %v836_v5  ;;  %v911_v23 = vor.u32 %v1018_v18, %v908_v19  ;;  %v1020_v30 = vld [vmem:[#allocation3 + $0xe4] sm:$0xf]  ;;  %v916_v31 = vld [vmem:[#allocation3 + $0xe8] sm:$0xf0]  ;;  %v855_v34 = vor.u32 %v1004_v28, %v852_v29  ;;  %v1006_v40 = vld [vmem:[#allocation3 + $0x74] sm:$0xf] }
  0x22   :  { %531 = vmatpush.bf16.msra.mxu1 %v1034_v11  ;;  %1148 = vmatpush.bf16.msra.mxu3 %v1034_v11  ;;  %v903_v11 = vor.u32 %v1016_v6, %v900_v7  ;;  %v919_v35 = vor.u32 %v1020_v30, %v916_v31  ;;  %v860_v41 = vld [vmem:[#allocation3 + $0x78] sm:$0xf0]  ;;  %v1022_v42 = vld [vmem:[#allocation3 + $0xf4] sm:$0xf] }
  0x23   :  { %v924_v43 = vld [vmem:[#allocation3 + $0xf8] sm:$0xf0]  ;;  %v863_v46 = vor.u32 %v1006_v40, %v860_v41 }
  0x24   :  { %v927_v47 = vor.u32 %v1022_v42, %v924_v43 }
  0x25   :  { %443 = vmatpush.bf16.msra.mxu0 %v1025_v12  ;;  %1141 = vmatpush.bf16.msra.mxu2 %v1025_v12  ;;  %v842_v12 = vld [vmem:[#allocation3 + $0x50] sm:$0xf] }
  0x26   :  { %532 = vmatpush.bf16.msra.mxu1 %v1033_v13  ;;  %1149 = vmatpush.bf16.msra.mxu3 %v1033_v13  ;;  %v1003_v13 = vld [vmem:[#allocation3 + $0x54] sm:$0xf0] }
  0x27   :  { %v843_v20 = vor.u32 %v1003_v13, %v842_v12 }
  0x29   :  { %444 = vmatpush.bf16.msra.mxu0 %v1024_v14  ;;  %1142 = vmatpush.bf16.msra.mxu2 %v1024_v14  ;;  %v906_v14 = vld [vmem:[#allocation3 + $0xd0] sm:$0xf] }
  0x2a   :  { %533 = vmatpush.bf16.msra.mxu1 %v1032_v15  ;;  %1150 = vmatpush.bf16.msra.mxu3 %v1032_v15  ;;  %v1019_v15 = vld [vmem:[#allocation3 + $0xd4] sm:$0xf0] }
  0x2b   :  { %v907_v21 = vor.u32 %v1019_v15, %v906_v14 }
  0x2c   :  { %445 = vmatmul.bf16.vlgmr.msra.gmra.mxu0 %v803_v24  ;;  %485 = vmatmul.bf16.vlgmr.msra.gmra.mxu2 %v867_v25  ;;  %v850_v24 = vld [vmem:[#allocation3 + $0x60] sm:$0xf]  ;;  %v1005_v25 = vld [vmem:[#allocation3 + $0x64] sm:$0xf0] }
  0x2d   :  { %534 = vmatmul.bf16.vlgmr.msra.gmra.mxu1 %v807_v26  ;;  %574 = vmatmul.bf16.vlgmr.msra.gmra.mxu3 %v871_v27  ;;  %v914_v26 = vld [vmem:[#allocation3 + $0xe0] sm:$0xf]  ;;  %v1021_v27 = vld [vmem:[#allocation3 + $0xe4] sm:$0xf0]  ;;  %v851_v32 = vor.u32 %v1005_v25, %v850_v24 }
  0x2e   :  { %v915_v33 = vor.u32 %v1021_v27, %v914_v26 }
  0x3c   :  { %450 = vmatmul.bf16.gmra.mxu0 %v811_v36  ;;  %490 = vmatmul.bf16.gmra.mxu2 %v875_v37  ;;  %v858_v36 = vld [vmem:[#allocation3 + $0x70] sm:$0xf]  ;;  %v1007_v37 = vld [vmem:[#allocation3 + $0x74] sm:$0xf0] }
  0x3d   :  { %539 = vmatmul.bf16.gmra.mxu1 %v815_v38  ;;  %579 = vmatmul.bf16.gmra.mxu3 %v879_v39  ;;  %v922_v38 = vld [vmem:[#allocation3 + $0xf0] sm:$0xf]  ;;  %v1023_v39 = vld [vmem:[#allocation3 + $0xf4] sm:$0xf0]  ;;  %v859_v44 = vor.u32 %v1007_v37, %v858_v36 }
  0x3e   :  { %v923_v45 = vor.u32 %v1023_v39, %v922_v38 }
  0x4c   :  { %455 = vmatmul.bf16.gmra.mxu0 %v819_v48  ;;  %495 = vmatmul.bf16.gmra.mxu2 %v883_v49 }
  0x4d   :  { %544 = vmatmul.bf16.gmra.mxu1 %v823_v50  ;;  %584 = vmatmul.bf16.gmra.mxu3 %v887_v51 }
  0x5c   :  { %460 = vmatmul.bf16.gmra.mxu0 %v827_v60  ;;  %500 = vmatmul.bf16.gmra.mxu2 %v891_v61 }
  0x5d   :  { %549 = vmatmul.bf16.gmra.mxu1 %v831_v62  ;;  %589 = vmatmul.bf16.gmra.mxu3 %v895_v63 }
  0x6c   :  { %465 = vmatmul.bf16.gmra.mxu0 %v835_v8  ;;  %505 = vmatmul.bf16.gmra.mxu2 %v899_v9 }
  0x6d   :  { %554 = vmatmul.bf16.gmra.mxu1 %v839_v10  ;;  %594 = vmatmul.bf16.gmra.mxu3 %v903_v11 }
  0x7c   :  { %470 = vmatmul.bf16.gmra.mxu0 %v843_v20  ;;  %510 = vmatmul.bf16.gmra.mxu2 %v907_v21 }
  0x7d   :  { %559 = vmatmul.bf16.gmra.mxu1 %v847_v22  ;;  %599 = vmatmul.bf16.gmra.mxu3 %v911_v23 }
  0x8c   :  { %475 = vmatmul.bf16.gmra.mxu0 %v851_v32  ;;  %515 = vmatmul.bf16.gmra.mxu2 %v915_v33 }
  0x8d   :  { %564 = vmatmul.bf16.gmra.mxu1 %v855_v34  ;;  %604 = vmatmul.bf16.gmra.mxu3 %v919_v35 }
  0x9c   :  { %480 = vmatmul.bf16.gmra.mxu0 %v859_v44  ;;  %520 = vmatmul.bf16.gmra.mxu2 %v923_v45 }
  0x9d   :  { %569 = vmatmul.bf16.gmra.mxu1 %v863_v46  ;;  %609 = vmatmul.bf16.gmra.mxu3 %v927_v47 }
  0xa9   :  { %v446_v48 = vpop.f32.mrf.mxu0 }
  0xaa   :  { %v535_v49 = vpop.f32.mrf.mxu1 }
  0xab   :  { %v536_v54 = vadd.f32 %v535_v49, %v446_v48 }
  0xaf   :  { %v486_v50 = vpop.f32.mrf.mxu2 }
  0xb0   :  { %v575_v51 = vpop.f32.mrf.mxu3 }
  0xb1   :  { %v448_v52 = vpop.f32.mrf.mxu0  ;;  %v576_v59 = vadd.f32 %v575_v51, %v486_v50 }
  0xb2   :  { %v537_v53 = vpop.f32.mrf.mxu1 }
  0xb3   :  { %v538_v55 = vadd.f32 %v537_v53, %v448_v52 }
  0xb5   :  { %v1043_v56 = vpack.c.bf16 %v538_v55, %v536_v54 }
  0xb7   :  { %1044 = vst [vmem:[#allocation8] sm:$0xff] %v1043_v56   ;;  %v488_v57 = vpop.f32.mrf.mxu2 }
  0xb8   :  { %v577_v58 = vpop.f32.mrf.mxu3 }
  0xb9   :  { %v578_v60 = vadd.f32 %v577_v58, %v488_v57  ;;  %v451_v61 = vpop.f32.mrf.mxu0 }
  0xba   :  { %v540_v62 = vpop.f32.mrf.mxu1 }
  0xbb   :  { %v1083_v63 = vpack.c.bf16 %v578_v60, %v576_v59  ;;  %v541_v4 = vadd.f32 %v540_v62, %v451_v61 }
  0xbd   :  { %1127 = vst [vmem:[#allocation8 + $0x40] sm:$0xff] %v1083_v63  }
  0xbf   :  { %v491_v0 = vpop.f32.mrf.mxu2 }
  0xc0   :  { %v580_v1 = vpop.f32.mrf.mxu3 }
  0xc1   :  { %v453_v2 = vpop.f32.mrf.mxu0  ;;  %v581_v9 = vadd.f32 %v580_v1, %v491_v0 }
  0xc2   :  { %v542_v3 = vpop.f32.mrf.mxu1 }
  0xc3   :  { %v543_v5 = vadd.f32 %v542_v3, %v453_v2 }
  0xc5   :  { %v1048_v6 = vpack.c.bf16 %v543_v5, %v541_v4 }
  0xc7   :  { %1120 = vst [vmem:[#allocation8 + $0x8] sm:$0xff] %v1048_v6   ;;  %v493_v7 = vpop.f32.mrf.mxu2 }
  0xc8   :  { %v582_v8 = vpop.f32.mrf.mxu3 }
  0xc9   :  { %v583_v10 = vadd.f32 %v582_v8, %v493_v7  ;;  %v456_v11 = vpop.f32.mrf.mxu0 }
  0xca   :  { %v545_v12 = vpop.f32.mrf.mxu1 }
  0xcb   :  { %v1088_v13 = vpack.c.bf16 %v583_v10, %v581_v9  ;;  %v546_v18 = vadd.f32 %v545_v12, %v456_v11 }
  0xcd   :  { %1128 = vst [vmem:[#allocation8 + $0x48] sm:$0xff] %v1088_v13  }
  0xcf   :  { %v496_v14 = vpop.f32.mrf.mxu2 }
  0xd0   :  { %v585_v15 = vpop.f32.mrf.mxu3 }
  0xd1   :  { %v458_v16 = vpop.f32.mrf.mxu0  ;;  %v586_v23 = vadd.f32 %v585_v15, %v496_v14 }
  0xd2   :  { %v547_v17 = vpop.f32.mrf.mxu1 }
  0xd3   :  { %v548_v19 = vadd.f32 %v547_v17, %v458_v16 }
  0xd5   :  { %v1053_v20 = vpack.c.bf16 %v548_v19, %v546_v18 }
  0xd7   :  { %1121 = vst [vmem:[#allocation8 + $0x10] sm:$0xff] %v1053_v20   ;;  %v498_v21 = vpop.f32.mrf.mxu2 }
  0xd8   :  { %v587_v22 = vpop.f32.mrf.mxu3 }
  0xd9   :  { %v588_v24 = vadd.f32 %v587_v22, %v498_v21  ;;  %v461_v25 = vpop.f32.mrf.mxu0 }
  0xda   :  { %v550_v26 = vpop.f32.mrf.mxu1 }
  0xdb   :  { %v1093_v27 = vpack.c.bf16 %v588_v24, %v586_v23  ;;  %v551_v32 = vadd.f32 %v550_v26, %v461_v25 }
  0xdd   :  { %1129 = vst [vmem:[#allocation8 + $0x50] sm:$0xff] %v1093_v27  }
  0xdf   :  { %v501_v28 = vpop.f32.mrf.mxu2 }
  0xe0   :  { %v590_v29 = vpop.f32.mrf.mxu3 }
  0xe1   :  { %v463_v30 = vpop.f32.mrf.mxu0  ;;  %v591_v37 = vadd.f32 %v590_v29, %v501_v28 }
  0xe2   :  { %v552_v31 = vpop.f32.mrf.mxu1 }
  0xe3   :  { %v553_v33 = vadd.f32 %v552_v31, %v463_v30 }
  0xe5   :  { %v1058_v34 = vpack.c.bf16 %v553_v33, %v551_v32 }
  0xe7   :  { %1122 = vst [vmem:[#allocation8 + $0x18] sm:$0xff] %v1058_v34   ;;  %v503_v35 = vpop.f32.mrf.mxu2 }
  0xe8   :  { %v592_v36 = vpop.f32.mrf.mxu3 }
  0xe9   :  { %v593_v38 = vadd.f32 %v592_v36, %v503_v35  ;;  %v466_v39 = vpop.f32.mrf.mxu0 }
  0xea   :  { %v555_v40 = vpop.f32.mrf.mxu1 }
  0xeb   :  { %v1098_v41 = vpack.c.bf16 %v593_v38, %v591_v37  ;;  %v556_v46 = vadd.f32 %v555_v40, %v466_v39 }
  0xed   :  { %1130 = vst [vmem:[#allocation8 + $0x58] sm:$0xff] %v1098_v41  }
  0xef   :  { %v506_v42 = vpop.f32.mrf.mxu2 }
  0xf0   :  { %v595_v43 = vpop.f32.mrf.mxu3 }
  0xf1   :  { %v468_v44 = vpop.f32.mrf.mxu0  ;;  %v596_v51 = vadd.f32 %v595_v43, %v506_v42 }
  0xf2   :  { %v557_v45 = vpop.f32.mrf.mxu1 }
  0xf3   :  { %v558_v47 = vadd.f32 %v557_v45, %v468_v44 }
  0xf5   :  { %v1063_v48 = vpack.c.bf16 %v558_v47, %v556_v46 }
  0xf7   :  { %1123 = vst [vmem:[#allocation8 + $0x20] sm:$0xff] %v1063_v48   ;;  %v508_v49 = vpop.f32.mrf.mxu2 }
  0xf8   :  { %v597_v50 = vpop.f32.mrf.mxu3 }
  0xf9   :  { %v598_v52 = vadd.f32 %v597_v50, %v508_v49  ;;  %v471_v53 = vpop.f32.mrf.mxu0 }
  0xfa   :  { %v560_v54 = vpop.f32.mrf.mxu1 }
  0xfb   :  { %v1103_v55 = vpack.c.bf16 %v598_v52, %v596_v51  ;;  %v561_v60 = vadd.f32 %v560_v54, %v471_v53 }
  0xfd   :  { %1131 = vst [vmem:[#allocation8 + $0x60] sm:$0xff] %v1103_v55  }
  0xff   :  { %v511_v56 = vpop.f32.mrf.mxu2 }
 0x100   :  { %v600_v57 = vpop.f32.mrf.mxu3 }
 0x101   :  { %v473_v58 = vpop.f32.mrf.mxu0  ;;  %v601_v1 = vadd.f32 %v600_v57, %v511_v56 }
 0x102   :  { %v562_v59 = vpop.f32.mrf.mxu1 }
 0x103   :  { %v563_v61 = vadd.f32 %v562_v59, %v473_v58 }
 0x105   :  { %v1068_v62 = vpack.c.bf16 %v563_v61, %v561_v60 }
 0x107   :  { %1124 = vst [vmem:[#allocation8 + $0x28] sm:$0xff] %v1068_v62   ;;  %v513_v63 = vpop.f32.mrf.mxu2 }
 0x108   :  { %v602_v0 = vpop.f32.mrf.mxu3 }
 0x109   :  { %v603_v2 = vadd.f32 %v602_v0, %v513_v63  ;;  %v476_v3 = vpop.f32.mrf.mxu0 }
 0x10a   :  { %v565_v4 = vpop.f32.mrf.mxu1 }
 0x10b   :  { %v1108_v5 = vpack.c.bf16 %v603_v2, %v601_v1  ;;  %v566_v10 = vadd.f32 %v565_v4, %v476_v3 }
 0x10d   :  { %1132 = vst [vmem:[#allocation8 + $0x68] sm:$0xff] %v1108_v5  }
 0x10f   :  { %v516_v6 = vpop.f32.mrf.mxu2 }
 0x110   :  { %v605_v7 = vpop.f32.mrf.mxu3 }
 0x111   :  { %v478_v8 = vpop.f32.mrf.mxu0  ;;  %v606_v15 = vadd.f32 %v605_v7, %v516_v6 }
 0x112   :  { %v567_v9 = vpop.f32.mrf.mxu1 }
 0x113   :  { %v568_v11 = vadd.f32 %v567_v9, %v478_v8 }
 0x115   :  { %v1073_v12 = vpack.c.bf16 %v568_v11, %v566_v10 }
 0x117   :  { %1125 = vst [vmem:[#allocation8 + $0x30] sm:$0xff] %v1073_v12   ;;  %v518_v13 = vpop.f32.mrf.mxu2 }
 0x118   :  { %v607_v14 = vpop.f32.mrf.mxu3 }
 0x119   :  { %v608_v16 = vadd.f32 %v607_v14, %v518_v13  ;;  %v481_v17 = vpop.f32.mrf.mxu0 }
 0x11a   :  { %v570_v18 = vpop.f32.mrf.mxu1 }
 0x11b   :  { %v1113_v19 = vpack.c.bf16 %v608_v16, %v606_v15  ;;  %v571_v24 = vadd.f32 %v570_v18, %v481_v17 }
 0x11d   :  { %1133 = vst [vmem:[#allocation8 + $0x70] sm:$0xff] %v1113_v19  }
 0x11f   :  { %v521_v20 = vpop.f32.mrf.mxu2 }
 0x120   :  { %v610_v21 = vpop.f32.mrf.mxu3 }
 0x121   :  { %v483_v22 = vpop.f32.mrf.mxu0  ;;  %v611_v29 = vadd.f32 %v610_v21, %v521_v20 }
 0x122   :  { %v572_v23 = vpop.f32.mrf.mxu1 }
 0x123   :  { %v573_v25 = vadd.f32 %v572_v23, %v483_v22 }
 0x125   :  { %v1078_v26 = vpack.c.bf16 %v573_v25, %v571_v24 }
 0x127   :  { %1126 = vst [vmem:[#allocation8 + $0x38] sm:$0xff] %v1078_v26   ;;  %v523_v27 = vpop.f32.mrf.mxu2 }
 0x128   :  { %v612_v28 = vpop.f32.mrf.mxu3 }
 0x129   :  { %v613_v30 = vadd.f32 %v612_v28, %v523_v27 }
 0x12b   :  { %v1118_v31 = vpack.c.bf16 %v613_v30, %v611_v29 }
 0x12d   :  { %1134 = vst [vmem:[#allocation8 + $0x78] sm:$0xff] %v1118_v31  }
 0x12e   :  { %790 = dma.vmem_to_hbm [thread:$0]  %s783_s1, 2048, %s785_s25, [#allocation5], %s1240_s21, %s1240_s21, %s1241_s22  }
 0x12f   :  { %1234 = dma.done.wait [#allocation5], 2048  }
 0x130   :  { %1235 = vsyncadd [#allocation5], 4294965248 }
 0x131   :  { %795 = vsyncpa [#allocation4], 1 }
 0x132   :  { %796 = vsyncpa [#allocation7], 1 }
 0x133   :  { %797 = vsyncpa [#allocation5], 1 }

</bundles_post_ra>
